<compile_context>
chip_gen: v6e
topology: v6e:2x2x1
jax: 0.10.0
libtpu: 0.0.40
codegen_flags: <defaults>
</compile_context>

<pallas_src>
import math

import jax
import jax.numpy as jnp
from jax.experimental import pallas as pl
from jax.experimental.pallas import tpu as pltpu


# -----------------------------------------------------------------------------
# Buffer construction — mirrors PositionalEncoding1D.create_positional_encoding
# -----------------------------------------------------------------------------
def create_positional_encoding(max_len: int, hidden_dim: int) -> jnp.ndarray:
    position = jnp.arange(0, max_len, dtype=jnp.float32)[:, None]          # (L, 1)
    div_term = jnp.exp(
        jnp.arange(0, hidden_dim, 2, dtype=jnp.float32)
        * (-math.log(10000.0) / hidden_dim)
    )                                                                      # (H/2,)
    pe = jnp.zeros((max_len, hidden_dim), dtype=jnp.float32)
    pe = pe.at[:, 0::2].set(jnp.sin(position * div_term))
    pe = pe.at[:, 1::2].set(jnp.cos(position * div_term))
    # pe.unsqueeze(0).transpose(0, 1) -> (max_len, 1, hidden_dim)
    return pe[:, None, :]


# -----------------------------------------------------------------------------
# Kernel: pure broadcast add (used for both the 3-D and the folded 2-D layout)
# -----------------------------------------------------------------------------
def _add_pe_kernel(x_ref, pe_ref, o_ref):
    # pe broadcasts in-vreg (along sublanes / leading dim); dtype cast in-kernel.
    o_ref[...] = (x_ref[...] + pe_ref[...]).astype(o_ref.dtype)


# -----------------------------------------------------------------------------
# Tiling helpers
# -----------------------------------------------------------------------------
def _sublane_multiple(*dtypes) -> int:
    smallest = min(jnp.dtype(d).itemsize for d in dtypes)
    return {4: 8, 2: 16, 1: 32}.get(smallest, 8)


def _round_down(x: int, m: int) -> int:
    return max(m, (x // m) * m)


def _select_budgets():
    """(per-block byte budget, vmem_limit_bytes), tuned per TPU generation."""
    try:
        vmem_cap = int(pltpu.get_tpu_info().vmem_capacity_bytes)
    except Exception:  # off-device tracing / older jax: assume the small VMEM
        vmem_cap = 64 * 1024 * 1024
    if vmem_cap >= 96 * 1024 * 1024:            # v5e / v6e: 128 MiB physical VMEM
        return 8 * 1024 * 1024, 80 * 1024 * 1024
    return 6 * 1024 * 1024, 40 * 1024 * 1024    # v7x: 64 MiB physical VMEM


def _choose_tiles_3d(Bo, So, Ho, elem_bytes, mult, budget):
    """(tb, ts) for (tb, ts, Ho) blocks; cdiv grid handles ragged edges."""
    row_bytes = max(1, Ho * elem_bytes)
    ts_cap = _round_down(max(1, budget // row_bytes), mult)
    ts = So if So <= ts_cap else ts_cap          # full axis is always layout-legal
    tb = max(1, budget // max(1, ts * row_bytes))
    tb = min(tb, Bo)
    if Bo >= 2:                                  # >=2 batch blocks -> megacore split
        tb = min(tb, pl.cdiv(Bo, 2))
    return tb, ts


def _choose_tiles_2d(Bo, So, Ho, elem_bytes, mult, budget):
    """(tb, ts) for (tb, ts*Ho) lane-folded blocks (Ho not a multiple of 128)."""
    q = 128 // math.gcd(Ho, 128)         # smallest seq fold giving 128-aligned lanes
    ts_target = q * pl.cdiv(2048, q * Ho)            # ~2048-lane dense stores
    ts_budget = _round_down(max(1, budget // max(1, mult * Ho * elem_bytes)), q)
    ts = max(q, min(ts_target, ts_budget))
    if ts >= So:
        ts = So                                      # full folded axis: always legal
    lane = ts * Ho
    tb_cap = max(1, budget // max(1, lane * elem_bytes))
    tb = Bo if tb_cap >= Bo else min(Bo, _round_down(tb_cap, mult))
    if pl.cdiv(Bo, tb) == 1 and Bo >= 2 * mult:      # >=2 batch blocks when legal
        tb = _round_down(Bo // 2, mult)
    return tb, ts


# -----------------------------------------------------------------------------
# Wrapper
# -----------------------------------------------------------------------------
def positional_encoding_1d(
    x: jnp.ndarray,
    pe: jnp.ndarray,
    *,
    keep_input_dtype: bool = False,
    donate_x: bool = False,
) -> jnp.ndarray:
    """out = x + pe[:x.shape[1], :]   (dropout = identity, eval mode).

    keep_input_dtype: keep output in x.dtype (pre-casts the tiny pe operand)
        instead of torch's result-type promotion — halves output HBM bytes for
        bf16 activations; opt-in because it deviates from PyTorch numerics.
    donate_x: alias x's HBM buffer to the output (only used when shapes/dtypes
        match); set only if the caller donates x.
    """
    # TODO(synk): training-mode nn.Dropout (stochastic mask + 1/(1-p) scale) is
    # not implemented; if needed, fuse it in-kernel with pltpu.prng_seed /
    # pltpu.prng_random_bits (VPU slack is free in this DMA-bound kernel).
    S_in = x.shape[1]
    pe_s = pe[:S_in]                                         # (S_in, 1, H)

    # Torch-style broadcast (raises on incompatible shapes, like PyTorch).
    out_shape = jnp.broadcast_shapes(x.shape, pe_s.shape)
    Bo, So, Ho = out_shape
    out_dtype = x.dtype if keep_input_dtype else jnp.result_type(x.dtype, pe_s.dtype)
    if keep_input_dtype and pe_s.dtype != jnp.dtype(out_dtype):
        pe_s = pe_s.astype(out_dtype)                        # tiny wrapper-side cast

    elem_bytes = max(jnp.dtype(x.dtype).itemsize,
                     jnp.dtype(pe_s.dtype).itemsize,
                     jnp.dtype(out_dtype).itemsize)
    mult = _sublane_multiple(x.dtype, pe_s.dtype, out_dtype)
    budget, vmem_limit = _select_budgets()

    x_b_bcast = (x.shape[0] == 1 and Bo > 1)     # x broadcasts along batch
    pe_b_bcast = (pe_s.shape[0] == 1 and Bo > 1)

    compiler_params = pltpu.CompilerParams(
        # Batch axis feeds the v7x megacore split; sequence streams per core so
        # the resident pe tile is DMA'd once per batch tile. Neutral on v5e/v6e.
        dimension_semantics=("parallel", "arbitrary"),
        vmem_limit_bytes=vmem_limit,
    )
    out_bytes = Bo * So * Ho * jnp.dtype(out_dtype).itemsize

    use_lane_fold = (Ho % 128 != 0) and (x.shape == out_shape)
    if use_lane_fold:
        # Lane-dense path: fold (seq, hidden) into the lane axis so stores are
        # full-width `vst` instead of masked partial stores when H < 128.
        tb, ts = _choose_tiles_2d(Bo, So, Ho, elem_bytes, mult, budget)
        lane = ts * Ho
        x2 = x.reshape(Bo, So * Ho)                          # free contiguous view
        pe_row = pe_s[:, 0, :]                               # (Bp, Ho), tiny
        pe2 = jnp.tile(pe_row, (1, ts)) if ts > 1 else pe_row  # (Bp, ts*Ho)
        tbp = 1 if pe_b_bcast else tb

        grid = (pl.cdiv(Bo, tb), pl.cdiv(So, ts))
        in_specs = [
            pl.BlockSpec((tb, lane), lambda i, j: (i, j)),
            # pe tile ignores the sequence grid axis -> resident per batch tile.
            pl.BlockSpec((tbp, lane),
                         (lambda i, j: (0, 0)) if pe_b_bcast
                         else (lambda i, j: (i, 0))),
        ]
        out_specs = pl.BlockSpec((tb, lane), lambda i, j: (i, j))
        aliases = ({0: 0} if (donate_x and jnp.dtype(x.dtype) == jnp.dtype(out_dtype))
                   else {})
        bytes_accessed = int(x2.size * jnp.dtype(x2.dtype).itemsize
                             + pe2.size * jnp.dtype(pe2.dtype).itemsize
                             + out_bytes)
        out2 = pl.pallas_call(
            _add_pe_kernel,
            out_shape=jax.ShapeDtypeStruct((Bo, So * Ho), out_dtype),
            grid=grid,
            in_specs=in_specs,
            out_specs=out_specs,
            compiler_params=compiler_params,
            cost_estimate=pl.CostEstimate(flops=Bo * So * Ho, transcendentals=0,
                                          bytes_accessed=bytes_accessed),
            input_output_aliases=aliases,
        )(x2, pe2)
        return out2.reshape(Bo, So, Ho)

    # --- General 3-D path (H multiple of 128, or x needs batch broadcasting) ---
    tb, ts = _choose_tiles_3d(Bo, So, Ho, elem_bytes, mult, budget)
    x_block = (1 if x_b_bcast else tb, ts, Ho)
    pe_block = (1 if pe_b_bcast else tb, 1, Ho)

    grid = (pl.cdiv(Bo, tb), pl.cdiv(So, ts))
    in_specs = [
        # Any broadcast is expressed in the index_map — nothing full-size is
        # materialized in HBM before the kernel.
        pl.BlockSpec(x_block,
                     (lambda i, j: (0, j, 0)) if x_b_bcast
                     else (lambda i, j: (i, j, 0))),
        # pe tile ignores the sequence grid axis -> resident per batch tile.
        pl.BlockSpec(pe_block,
                     (lambda i, j: (0, 0, 0)) if pe_b_bcast
                     else (lambda i, j: (i, 0, 0))),
    ]
    out_specs = pl.BlockSpec((tb, ts, Ho), lambda i, j: (i, j, 0))

    aliases = ({0: 0} if (donate_x and not x_b_bcast
                          and jnp.dtype(x.dtype) == jnp.dtype(out_dtype)) else {})
    bytes_accessed = int(x.size * jnp.dtype(x.dtype).itemsize
                         + pe_s.size * jnp.dtype(pe_s.dtype).itemsize
                         + out_bytes)
    return pl.pallas_call(
        _add_pe_kernel,
        out_shape=jax.ShapeDtypeStruct((Bo, So, Ho), out_dtype),
        grid=grid,
        in_specs=in_specs,
        out_specs=out_specs,
        compiler_params=compiler_params,
        cost_estimate=pl.CostEstimate(flops=Bo * So * Ho, transcendentals=0,
                                      bytes_accessed=bytes_accessed),
        input_output_aliases=aliases,
    )(x, pe_s)


# -----------------------------------------------------------------------------
# Demo / correctness check
# -----------------------------------------------------------------------------
if __name__ == "__main__":
    key = jax.random.PRNGKey(0)
    k1, k2 = jax.random.split(key)

    # Primary: H = 32 (not a multiple of 128) -> lane-dense folded 2-D path.
    # Torch validity of (B,S,H)+(S,1,H) requires B == S.
    B, S, H = 8, 8, 32
    max_len = 16
    pe = create_positional_encoding(max_len, H)                 # (16, 1, 32)
    x = jax.random.normal(k1, (B, S, H), dtype=jnp.float32)
    out = jax.block_until_ready(positional_encoding_1d(x, pe))
    ref = x + pe[: x.shape[1], :, :]
    assert out.shape == ref.shape and out.dtype == ref.dtype
    assert jnp.allclose(out, ref, atol=1e-6, rtol=1e-6)

    # Secondary: H = 128 (lane-aligned) -> general 3-D tiled path.
    B2, S2, H2 = 4, 4, 128
    pe_b = create_positional_encoding(8, H2)                    # (8, 1, 128)
    x2 = jax.random.normal(k2, (B2, S2, H2), dtype=jnp.float32)
    out2 = jax.block_until_ready(positional_encoding_1d(x2, pe_b))
    ref2 = x2 + pe_b[: x2.shape[1], :, :]
    assert out2.shape == ref2.shape and out2.dtype == ref2.dtype
    assert jnp.allclose(out2, ref2, atol=1e-6, rtol=1e-6)

    print("KERNEL_OK")
</pallas_src>

<mosaic_0001>
module attributes {stable_mosaic.version = 11 : i64} {
  func.func @_add_pe_kernel(%arg0: i32, %arg1: i32, %arg2: memref<8x256xf32, #tpu.memory_space<vmem>>, %arg3: memref<8x256xf32, #tpu.memory_space<vmem>>, %arg4: memref<8x256xf32, #tpu.memory_space<vmem>>) attributes {dimension_semantics = [#tpu.dimension_semantics<parallel>, #tpu.dimension_semantics<arbitrary>], iteration_bounds = array<i64: 1, 1>, scalar_prefetch = 0 : i64, scratch_operands = 0 : i64, tpu.core_type = #tpu.core_type<tc>, window_params = [{transform_indices = @transform_0, window_bounds = array<i64: 8, 256>}, {transform_indices = @transform_1, window_bounds = array<i64: 8, 256>}, {transform_indices = @transform_2, window_bounds = array<i64: 8, 256>}]} {
    %c0 = arith.constant 0 : index
    %c0_0 = arith.constant 0 : index
    %0 = vector.load %arg2[%c0, %c0_0] : memref<8x256xf32, #tpu.memory_space<vmem>>, vector<8x256xf32>
    %c0_1 = arith.constant 0 : index
    %c0_2 = arith.constant 0 : index
    %1 = vector.load %arg3[%c0_1, %c0_2] : memref<8x256xf32, #tpu.memory_space<vmem>>, vector<8x256xf32>
    %2 = arith.addf %0, %1 : vector<8x256xf32>
    %c0_3 = arith.constant 0 : index
    %c0_4 = arith.constant 0 : index
    %3 = vector.load %arg4[%c0_3, %c0_4] : memref<8x256xf32, #tpu.memory_space<vmem>>, vector<8x256xf32>
    tpu.vector_store %arg4[%c0_3, %c0_4], %2 {strides = array<i32>} : memref<8x256xf32, #tpu.memory_space<vmem>>, vector<8x256xf32>,
    return
  }
  func.func @transform_0(%arg0: i32, %arg1: i32) -> (i32, i32) {
    %c0_i32 = arith.constant 0 : i32
    return %arg0, %arg1 : i32, i32
  }
  func.func @transform_1(%arg0: i32, %arg1: i32) -> (i32, i32) {
    %c0_i32 = arith.constant 0 : i32
    %c0_i32_0 = arith.constant 0 : i32
    return %arg0, %c0_i32 : i32, i32
  }
  func.func @transform_2(%arg0: i32, %arg1: i32) -> (i32, i32) {
    %c0_i32 = arith.constant 0 : i32
    return %arg0, %arg1 : i32, i32
  }
}

</mosaic_0001>

<bundles_post_ra>
// kernel: tpu_custom_call.1
= control target key start
LH: loop header
LB: loop body
LE: loop exit
PB: predicated region body
PF: predicated region fallthrough
CT: control target
= control target key end

     0   :  { %7 = vsyncpa [#allocation3], 0  ;;  %s156_s0 = inlined_call_operand.hbm [shape: f32[8,256], index: 0, kind: input, shape index: {}]   ;;  %s157_s1 = inlined_call_operand.hbm [shape: f32[8,256], index: 1, kind: input, shape index: {}]   ;;  %s158_s2 = inlined_call_operand.hbm [shape: f32[8,256], index: 2, kind: output, shape index: {}]  }
   0x1   :  { %8 = vsyncpa [#allocation6], 0 }
   0x2   :  { %9 = vsyncpa [#allocation4], 0  ;;  %s129_s9 = smov [#allocation2]   ;;  %s130_s11 = smov [#allocation5]  }
   0x3   :  { %s16_s10 = sshll.u32 %s129_s9, 4  ;;  %s26_s12 = sshll.u32 %s130_s11, 4  ;;  %s17_s10 = int_to_ptr.vmem [resolvable:$true] %s16_s10  ;;  %s27_s12 = int_to_ptr.vmem [resolvable:$true] %s26_s12 }
   0x4   :  { %s71_s13 = scalar_lea.vmem %s17_s10, 256  ;;  %p76_p1 = scmp.lt.s32.totalorder %s17_s10, %s17_s10 }
   0x5   :  { %p72_p0 = scmp.ne.s32.totalorder %s17_s10, %s71_s13  ;;  %p77_p2 = scmp.lt.s32.totalorder %s71_s13, %s71_s13 }
   0x7   :  { %p78_p3 = por %p77_p2, %p76_p1 }
   0x9   :  { %p79_p4 = pnand %p78_p3, %p72_p0 }
   0xb   :  { %82 = shalt.err (!%p79_p4)
}
   0xc   :  { %19 = dma.hbm_to_vmem [thread:$0]  %s156_s0, 256, %s17_s10, [#allocation3]  }
   0xd   :  { %s91_s16 = scalar_lea.vmem %s27_s12, 256  ;;  %p96_p6 = scmp.lt.s32.totalorder %s27_s12, %s27_s12 }
   0xe   :  { %p92_p5 = scmp.ne.s32.totalorder %s27_s12, %s91_s16  ;;  %p97_p7 = scmp.lt.s32.totalorder %s91_s16, %s91_s16 }
  0x10   :  { %p98_p8 = por %p97_p7, %p96_p6 }
  0x12   :  { %p99_p9 = pnand %p98_p8, %p92_p5 }
  0x14   :  { %102 = shalt.err (!%p99_p9)
}
  0x15   :  { %29 = dma.hbm_to_vmem [thread:$0]  %s157_s1, 256, %s27_s12, [#allocation6]  }
  0x16   :  { %123 = dma.done.wait [#allocation3], 256  }
  0x17   :  { %124 = vsyncadd [#allocation3], 4294967040 }
  0x18   :  { %125 = dma.done.wait [#allocation6], 256  }
  0x19   :  { %126 = vsyncadd [#allocation6], 4294967040  ;;  %s131_s19 = smov [#allocation7]   ;;  %v36_v0 = vld [vmem:[#allocation2] sm:$0xff]  ;;  %v38_v1 = vld [vmem:[#allocation5] sm:$0xff] }
  0x1a   :  { %s50_s20 = sshll.u32 %s131_s19, 4  ;;  %v37_v2 = vld [vmem:[#allocation2 + $0x8] sm:$0xff]  ;;  %v40_v3 = vadd.f32 %v38_v1, %v36_v0  ;;  %v39_v4 = vld [vmem:[#allocation5 + $0x8] sm:$0xff]  ;;  %s51_s20 = int_to_ptr.vmem [resolvable:$true] %s50_s20 }
  0x1b   :  { %v41_v5 = vadd.f32 %v39_v4, %v37_v2  ;;  %s103_s0 = scalar_lea.vmem %s51_s20, 256  ;;  %p108_p11 = scmp.lt.s32.totalorder %s51_s20, %s51_s20 }
  0x1c   :  { %42 = vst [vmem:[#allocation7] sm:$0xff] %v40_v3  ;;  %p104_p10 = scmp.ne.s32.totalorder %s51_s20, %s103_s0  ;;  %p109_p12 = scmp.lt.s32.totalorder %s103_s0, %s103_s0 }
  0x1d   :  { %43 = vst [vmem:[#allocation7 + $0x8] sm:$0xff] %v41_v5 }
  0x1e   :  { %p110_p13 = por %p109_p12, %p108_p11 }
  0x20   :  { %p111_p0 = pnand %p110_p13, %p104_p10 }
  0x22   :  { %114 = shalt.err (!%p111_p0)
}
  0x23   :  { %53 = dma.vmem_to_hbm [thread:$0]  %s51_s20, 256, %s158_s2, [#allocation4]  }
  0x24   :  { %127 = dma.done.wait [#allocation4], 256  }
  0x25   :  { %128 = vsyncadd [#allocation4], 4294967040 }
  0x26   :  { %57 = vsyncpa [#allocation3], 1 }
  0x27   :  { %58 = vsyncpa [#allocation6], 1 }
  0x28   :  { %59 = vsyncpa [#allocation4], 1 }

</bundles_post_ra>
